<compile_context>
chip_gen: v7x
topology: tpu7x:2x2x1
jax: 0.10.0
libtpu: 0.0.40
codegen_flags: <defaults>
</compile_context>

<pallas_src>
import functools

import jax
import jax.numpy as jnp
from jax.experimental import pallas as pl
from jax.experimental.pallas import tpu as pltpu

_NEG_BIG = -1e30  # large-finite fill instead of -inf (keeps fully-padded rows NaN-free)


def _encoder_classifier_kernel(seq_ref, lens_ref, labels_ref, w_ref, b_ref,
                               pred_ref, loss_ref,
                               pooled_acc, denom_acc,
                               *, pool_type, tile_t, n_classes):
    t = pl.program_id(1)
    n_t = pl.num_programs(1)

    # ---- init accumulators on the first T-tile of each B-tile ----
    @pl.when(t == 0)
    def _():
        if pool_type == 'max':
            pooled_acc[...] = jnp.full_like(pooled_acc, _NEG_BIG)
        else:
            pooled_acc[...] = jnp.zeros_like(pooled_acc)
        denom_acc[...] = jnp.zeros_like(denom_acc)

    seq = seq_ref[...].astype(jnp.float32)          # (TB, TT, D) cast per tile
    lens = lens_ref[...]                            # (TB, 1) int32
    tb, tt, _ = seq.shape

    # Valid-token mask built from lengths + iota (replaces the (B,T,1) mask tensor).
    pos = jax.lax.broadcasted_iota(jnp.int32, (tb, tt, 1), 1) + t * tile_t
    valid = pos < lens[:, :, None]                  # (TB, TT, 1) bool

    # ---- Pooler (project=False): streaming max / mean over T ----
    if pool_type == 'max':
        tile_max = jnp.max(jnp.where(valid, seq, _NEG_BIG), axis=1)     # (TB, D)
        pooled_acc[...] = jnp.maximum(pooled_acc[...], tile_max)
    elif pool_type == 'mean':
        mask_f = valid.astype(jnp.float32)
        pooled_acc[...] += jnp.sum(seq * mask_f, axis=1)                # (TB, D)
        denom_acc[...] += jnp.sum(mask_f, axis=1)                       # (TB, 1)
    else:
        raise ValueError(f"unsupported pool_type: {pool_type}")

    # ---- epilogue: classifier (log_reg) + argmax + CE(sum), once per B-tile ----
    @pl.when(t == n_t - 1)
    def _():
        if pool_type == 'max':
            pooled = pooled_acc[...]
        else:
            pooled = pooled_acc[...] / jnp.maximum(denom_acc[...], 1.0)

        logits = jnp.dot(pooled, w_ref[...],
                         preferred_element_type=jnp.float32) + b_ref[...]    # (TB, C)

        # single row-max reused for both argmax and the LSE
        maxv = jnp.max(logits, axis=-1, keepdims=True)                       # (TB, 1)

        cls_idx = jax.lax.broadcasted_iota(jnp.int32, logits.shape, 1)       # (TB, C)
        pred_ref[...] = jnp.min(jnp.where(logits == maxv, cls_idx, n_classes),
                                axis=-1, keepdims=True)                      # (TB, 1)

        lse = maxv + jnp.log(jnp.sum(jnp.exp(logits - maxv),
                                     axis=-1, keepdims=True))                # (TB, 1)
        onehot = (cls_idx == labels_ref[...]).astype(jnp.float32)            # (TB, C)
        picked = jnp.sum(logits * onehot, axis=-1, keepdims=True)            # (TB, 1)
        loss_ref[...] = lse - picked                                         # per-example


def _pick_time_tile(T, bytes_per_t_row, budget_bytes=8 * 1024 * 1024):
    """Largest T-tile (multiple of 8 dividing T, or T itself) under a per-buffer budget."""
    if T * bytes_per_t_row <= budget_bytes:
        return T
    cap = max(8, budget_bytes // max(bytes_per_t_row, 1))
    start = (min(T, cap) // 8) * 8
    for tt in range(start, 0, -8):
        if T % tt == 0:
            return tt
    return T


def encoder_classifier_forward(sequence, nopad_mask, weight, bias, labels,
                               n_classes, pool_type='max'):
    """sequence: (B, T, D) (any float dtype, kept native in HBM); nopad_mask: (B, T) {0,1};
       weight: (C, D) torch-style; bias: (C,); labels: (B,) int32.
       Returns (pred (B,) int32, loss () f32)."""
    B, T, D = sequence.shape
    C = n_classes
    itemsize = jnp.dtype(sequence.dtype).itemsize

    # B-tile: keep last-two-dims legality for (TB, 1) outputs (TB == B or TB % 8 == 0).
    TB = B if (B <= 8 or B % 8 != 0) else 8
    TT = _pick_time_tile(T, TB * D * itemsize)
    assert B % TB == 0 and T % TT == 0
    nB, nT = B // TB, T // TT

    # Tiny side inputs replace the big (B,T,1) mask / (B,C) one-hot tensors.
    lengths = jnp.sum(nopad_mask.astype(jnp.float32), axis=1).astype(jnp.int32).reshape(B, 1)
    labels2 = jnp.asarray(labels, jnp.int32).reshape(B, 1)
    w_t = jnp.asarray(weight, jnp.float32).T.reshape(D, C)      # x @ W.T == x @ w_t
    b2 = jnp.asarray(bias, jnp.float32).reshape(1, C)

    kernel = functools.partial(_encoder_classifier_kernel,
                               pool_type=pool_type, tile_t=TT, n_classes=C)

    # VMEM budget: 2x double-buffered sequence tile + scratch + small params, with headroom.
    seq_tile_bytes = TB * TT * D * itemsize
    vmem_need = 2 * seq_tile_bytes + 4 * TB * (D + 1) + 4 * (D * C + C) + (2 << 20)
    vmem_limit_bytes = int(min(max(2 * vmem_need, 16 * 1024 * 1024), 48 * 1024 * 1024))

    cost = pl.CostEstimate(
        flops=3 * B * T * D + 2 * B * D * C,
        transcendentals=2 * B * C,
        bytes_accessed=B * T * D * itemsize + 4 * (D * C + C) + 16 * B,
    )

    pred2, loss2 = pl.pallas_call(
        kernel,
        grid_spec=pltpu.PrefetchScalarGridSpec(
            num_scalar_prefetch=0,
            grid=(nB, nT),
            in_specs=[
                pl.BlockSpec((TB, TT, D), lambda b, t: (b, t, 0)),   # sequence stream
                pl.BlockSpec((TB, 1), lambda b, t: (b, 0)),          # lengths
                pl.BlockSpec((TB, 1), lambda b, t: (b, 0)),          # labels
                pl.BlockSpec((D, C), lambda b, t: (0, 0)),           # classifier weight
                pl.BlockSpec((1, C), lambda b, t: (0, 0)),           # classifier bias
            ],
            out_specs=(
                pl.BlockSpec((TB, 1), lambda b, t: (b, 0)),          # pred
                pl.BlockSpec((TB, 1), lambda b, t: (b, 0)),          # per-example loss
            ),
            scratch_shapes=[
                pltpu.VMEM((TB, D), jnp.float32),                    # pooled accumulator
                pltpu.VMEM((TB, 1), jnp.float32),                    # mean denom accumulator
            ],
        ),
        out_shape=(
            jax.ShapeDtypeStruct((B, 1), jnp.int32),
            jax.ShapeDtypeStruct((B, 1), jnp.float32),
        ),
        compiler_params=pltpu.CompilerParams(
            dimension_semantics=("parallel", "arbitrary"),
            vmem_limit_bytes=vmem_limit_bytes,
        ),
        cost_estimate=cost,
    )(sequence, lengths, labels2, w_t, b2)

    # CrossEntropyLoss(reduction='sum'): cheap scalar reduction of per-example losses.
    return pred2.reshape(B), jnp.sum(loss2)


if __name__ == "__main__":
    key = jax.random.PRNGKey(0)
    B, T, D, C = 2, 8, 32, 4  # batch, seq len, encoder dim, n_classes
    k_seq, k_w, k_b, k_lbl = jax.random.split(key, 4)

    # Synthesized encoder output (the real encoder is external to this module).
    sequence = jax.random.normal(k_seq, (B, T, D), dtype=jnp.float32)
    lengths = jnp.array([6, 8], dtype=jnp.int32)
    nopad_mask = (jnp.arange(T)[None, :] < lengths[:, None]).astype(jnp.float32)

    # Deterministic classifier params (nn.Linear(enc_dim, n_classes)): weight (C, D), bias (C,)
    weight = jax.random.normal(k_w, (C, D), dtype=jnp.float32) * 0.1
    bias = jax.random.normal(k_b, (C,), dtype=jnp.float32) * 0.1
    labels = jax.random.randint(k_lbl, (B,), 0, C, dtype=jnp.int32)

    ok = True
    for pool_type in ("max", "mean"):
        pred, loss = encoder_classifier_forward(sequence, nopad_mask, weight, bias,
                                                labels, C, pool_type=pool_type)
        jax.block_until_ready((pred, loss))

        # Plain-JAX reference (same math as the PyTorch module).
        mask3 = nopad_mask[:, :, None]
        if pool_type == "max":
            pooled = jnp.max(jnp.where(mask3 == 0, -jnp.inf, sequence), axis=1)
        else:
            pooled = jnp.sum(sequence * mask3, axis=1) / jnp.sum(mask3, axis=1)
        ref_logits = pooled @ weight.T + bias
        ref_pred = jnp.argmax(ref_logits, axis=-1)
        ref_loss = jnp.sum(jax.nn.logsumexp(ref_logits, axis=-1)
                           - ref_logits[jnp.arange(B), labels])
        ok &= bool(jnp.all(pred == ref_pred))
        ok &= bool(jnp.allclose(loss, ref_loss, rtol=1e-3, atol=1e-3))

    print("KERNEL_OK" if ok else "KERNEL_MISMATCH")
</pallas_src>

<mosaic_0001>
module attributes {stable_mosaic.version = 11 : i64} {
  func.func @_encoder_classifier_kernel(%arg0: i32, %arg1: i32, %arg2: memref<2x8x32xf32, #tpu.memory_space<vmem>>, %arg3: memref<2x1xi32, #tpu.memory_space<vmem>>, %arg4: memref<2x1xi32, #tpu.memory_space<vmem>>, %arg5: memref<32x4xf32, #tpu.memory_space<vmem>>, %arg6: memref<1x4xf32, #tpu.memory_space<vmem>>, %arg7: memref<2x1xi32, #tpu.memory_space<vmem>>, %arg8: memref<2x1xf32, #tpu.memory_space<vmem>>, %arg9: memref<2x32xf32, #tpu.memory_space<vmem>>, %arg10: memref<2x1xf32, #tpu.memory_space<vmem>>) attributes {dimension_semantics = [#tpu.dimension_semantics<parallel>, #tpu.dimension_semantics<arbitrary>], iteration_bounds = array<i64: 1, 1>, scalar_prefetch = 0 : i64, scratch_operands = 2 : i64, tpu.core_type = #tpu.core_type<tc>, window_params = [{transform_indices = @transform_0, window_bounds = array<i64: 2, 8, 32>}, {transform_indices = @transform_1, window_bounds = array<i64: 2, 1>}, {transform_indices = @transform_2, window_bounds = array<i64: 2, 1>}, {pipeline_mode = #tpu.pipeline_mode<synchronous>, transform_indices = @transform_3, window_bounds = array<i64: 32, 4>}, {pipeline_mode = #tpu.pipeline_mode<synchronous>, transform_indices = @transform_4, window_bounds = array<i64: 1, 4>}, {transform_indices = @transform_5, window_bounds = array<i64: 2, 1>}, {transform_indices = @transform_6, window_bounds = array<i64: 2, 1>}]} {
    %c0_i32 = arith.constant 0 : i32
    %0 = arith.cmpi eq, %arg1, %c0_i32 : i32
    %1 = arith.extui %0 : i1 to i32
    %c0_i32_0 = arith.constant 0 : i32
    %2 = arith.cmpi ne, %1, %c0_i32_0 : i32
    scf.if %2 {
      %cst_12 = arith.constant -1.000000e+30 : f32
      %23 = vector.broadcast %cst_12 : f32 to vector<2x32xf32>
      %c0_13 = arith.constant 0 : index
      %c0_14 = arith.constant 0 : index
      %24 = vector.load %arg9[%c0_13, %c0_14] : memref<2x32xf32, #tpu.memory_space<vmem>>, vector<2x32xf32>
      tpu.vector_store %arg9[%c0_13, %c0_14], %23 {strides = array<i32>} : memref<2x32xf32, #tpu.memory_space<vmem>>, vector<2x32xf32>,
      %cst_15 = arith.constant 0.000000e+00 : f32
      %25 = vector.broadcast %cst_15 : f32 to vector<2x1xf32>
      %c0_16 = arith.constant 0 : index
      %c0_17 = arith.constant 0 : index
      %26 = vector.load %arg10[%c0_16, %c0_17] : memref<2x1xf32, #tpu.memory_space<vmem>>, vector<2x1xf32>
      tpu.vector_store %arg10[%c0_16, %c0_17], %25 {strides = array<i32>} : memref<2x1xf32, #tpu.memory_space<vmem>>, vector<2x1xf32>,
    } else {
    }
    %c0 = arith.constant 0 : index
    %c0_1 = arith.constant 0 : index
    %c0_2 = arith.constant 0 : index
    %3 = vector.load %arg2[%c0, %c0_1, %c0_2] : memref<2x8x32xf32, #tpu.memory_space<vmem>>, vector<2x8x32xf32>
    %c0_3 = arith.constant 0 : index
    %c0_4 = arith.constant 0 : index
    %4 = vector.load %arg3[%c0_3, %c0_4] : memref<2x1xi32, #tpu.memory_space<vmem>>, vector<2x1xi32>
    %5 = tpu.iota {dimensions = array<i32: 1>} : vector<2x8x1xi32>
    %c8_i32 = arith.constant 8 : i32
    %6 = arith.muli %arg1, %c8_i32 : i32
    %7 = vector.broadcast %6 : i32 to vector<2x8x1xi32>
    %8 = arith.addi %5, %7 : vector<2x8x1xi32>
    %9 = vector.shape_cast %4 : vector<2x1xi32> to vector<2x1x1xi32>
    %10 = vector.broadcast %9 : vector<2x1x1xi32> to vector<2x8x1xi32>
    %11 = arith.cmpi slt, %8, %10 : vector<2x8x1xi32>
    %cst = arith.constant -1.000000e+30 : f32
    %12 = vector.shape_cast %11 : vector<2x8x1xi1> to vector<2x8x1xi1>
    %13 = vector.broadcast %12 : vector<2x8x1xi1> to vector<2x8x32xi1>
    %14 = vector.broadcast %cst : f32 to vector<2x8x32xf32>
    %15 = arith.select %13, %3, %14 : vector<2x8x32xi1>, vector<2x8x32xf32>
    %cst_5 = arith.constant dense<0xFF800000> : vector<2x32xf32>
    %16 = vector.multi_reduction <maximumf>, %15, %cst_5 [1] : vector<2x8x32xf32> to vector<2x32xf32>
    %c0_6 = arith.constant 0 : index
    %c0_7 = arith.constant 0 : index
    %17 = vector.load %arg9[%c0_6, %c0_7] : memref<2x32xf32, #tpu.memory_space<vmem>>, vector<2x32xf32>
    %18 = arith.maximumf %17, %16 : vector<2x32xf32>
    %c0_8 = arith.constant 0 : index
    %c0_9 = arith.constant 0 : index
    %19 = vector.load %arg9[%c0_8, %c0_9] : memref<2x32xf32, #tpu.memory_space<vmem>>, vector<2x32xf32>
    tpu.vector_store %arg9[%c0_8, %c0_9], %18 {strides = array<i32>} : memref<2x32xf32, #tpu.memory_space<vmem>>, vector<2x32xf32>,
    %c0_i32_10 = arith.constant 0 : i32
    %20 = arith.cmpi eq, %arg1, %c0_i32_10 : i32
    %21 = arith.extui %20 : i1 to i32
    %c0_i32_11 = arith.constant 0 : i32
    %22 = arith.cmpi ne, %21, %c0_i32_11 : i32
    scf.if %22 {
      %c0_12 = arith.constant 0 : index
      %c0_13 = arith.constant 0 : index
      %23 = vector.load %arg9[%c0_12, %c0_13] : memref<2x32xf32, #tpu.memory_space<vmem>>, vector<2x32xf32>
      %c0_14 = arith.constant 0 : index
      %c0_15 = arith.constant 0 : index
      %24 = vector.load %arg5[%c0_14, %c0_15] : memref<32x4xf32, #tpu.memory_space<vmem>>, vector<32x4xf32>
      %cst_16 = arith.constant dense<0.000000e+00> : vector<2x4xf32>
      %25 = tpu.matmul %23, %24, %cst_16 {dimension_numbers = #tpu.dot_dimension_numbers<[1], [0], [0], [1], [0, 0, 1, 1], [], []>} : vector<2x32xf32>, vector<32x4xf32>, vector<2x4xf32> -> vector<2x4xf32>
      %c0_17 = arith.constant 0 : index
      %c0_18 = arith.constant 0 : index
      %26 = vector.load %arg6[%c0_17, %c0_18] : memref<1x4xf32, #tpu.memory_space<vmem>>, vector<1x4xf32>
      %27 = vector.broadcast %26 : vector<1x4xf32> to vector<2x4xf32>
      %28 = arith.addf %25, %27 : vector<2x4xf32>
      %cst_19 = arith.constant dense<0xFF800000> : vector<2xf32>
      %29 = vector.multi_reduction <maximumf>, %28, %cst_19 [1] : vector<2x4xf32> to vector<2xf32>
      %30 = vector.shape_cast %29 : vector<2xf32> to vector<2x1xf32>
      %31 = tpu.iota {dimensions = array<i32: 1>} : vector<2x4xi32>
      %32 = vector.broadcast %30 : vector<2x1xf32> to vector<2x4xf32>
      %33 = arith.cmpf oeq, %28, %32 : vector<2x4xf32>
      %c4_i32 = arith.constant 4 : i32
      %34 = vector.broadcast %c4_i32 : i32 to vector<2x4xi32>
      %35 = arith.select %33, %31, %34 : vector<2x4xi1>, vector<2x4xi32>
      %cst_20 = arith.constant dense<2147483647> : vector<2xi32>
      %36 = vector.multi_reduction <minsi>, %35, %cst_20 [1] : vector<2x4xi32> to vector<2xi32>
      %37 = vector.shape_cast %36 : vector<2xi32> to vector<2x1xi32>
      %c0_21 = arith.constant 0 : index
      %c0_22 = arith.constant 0 : index
      %38 = vector.load %arg7[%c0_21, %c0_22] : memref<2x1xi32, #tpu.memory_space<vmem>>, vector<2x1xi32>
      tpu.vector_store %arg7[%c0_21, %c0_22], %37 {strides = array<i32>} : memref<2x1xi32, #tpu.memory_space<vmem>>, vector<2x1xi32>,
      %39 = vector.broadcast %30 : vector<2x1xf32> to vector<2x4xf32>
      %40 = arith.subf %28, %39 : vector<2x4xf32>
      %41 = math.exp %40 : vector<2x4xf32>
      %cst_23 = arith.constant dense<0.000000e+00> : vector<2xf32>
      %42 = vector.multi_reduction <add>, %41, %cst_23 [1] : vector<2x4xf32> to vector<2xf32>
      %43 = vector.shape_cast %42 : vector<2xf32> to vector<2x1xf32>
      %44 = math.log %43 : vector<2x1xf32>
      %45 = arith.addf %30, %44 : vector<2x1xf32>
      %c0_24 = arith.constant 0 : index
      %c0_25 = arith.constant 0 : index
      %46 = vector.load %arg4[%c0_24, %c0_25] : memref<2x1xi32, #tpu.memory_space<vmem>>, vector<2x1xi32>
      %47 = vector.broadcast %46 : vector<2x1xi32> to vector<2x4xi32>
      %48 = arith.cmpi eq, %31, %47 : vector<2x4xi32>
      %49 = arith.extui %48 : vector<2x4xi1> to vector<2x4xi32>
      %50 = arith.sitofp %49 : vector<2x4xi32> to vector<2x4xf32>
      %51 = arith.mulf %28, %50 : vector<2x4xf32>
      %cst_26 = arith.constant dense<0.000000e+00> : vector<2xf32>
      %52 = vector.multi_reduction <add>, %51, %cst_26 [1] : vector<2x4xf32> to vector<2xf32>
      %53 = vector.shape_cast %52 : vector<2xf32> to vector<2x1xf32>
      %54 = arith.subf %45, %53 : vector<2x1xf32>
      %c0_27 = arith.constant 0 : index
      %c0_28 = arith.constant 0 : index
      %55 = vector.load %arg8[%c0_27, %c0_28] : memref<2x1xf32, #tpu.memory_space<vmem>>, vector<2x1xf32>
      tpu.vector_store %arg8[%c0_27, %c0_28], %54 {strides = array<i32>} : memref<2x1xf32, #tpu.memory_space<vmem>>, vector<2x1xf32>,
    } else {
    }
    return
  }
  func.func @transform_0(%arg0: i32, %arg1: i32) -> (i32, i32, i32) {
    %c0_i32 = arith.constant 0 : i32
    %c0_i32_0 = arith.constant 0 : i32
    return %arg0, %arg1, %c0_i32 : i32, i32, i32
  }
  func.func @transform_1(%arg0: i32, %arg1: i32) -> (i32, i32) {
    %c0_i32 = arith.constant 0 : i32
    %c0_i32_0 = arith.constant 0 : i32
    return %arg0, %c0_i32 : i32, i32
  }
  func.func @transform_2(%arg0: i32, %arg1: i32) -> (i32, i32) {
    %c0_i32 = arith.constant 0 : i32
    %c0_i32_0 = arith.constant 0 : i32
    return %arg0, %c0_i32 : i32, i32
  }
  func.func @transform_3(%arg0: i32, %arg1: i32) -> (i32, i32) {
    %c0_i32 = arith.constant 0 : i32
    %c0_i32_0 = arith.constant 0 : i32
    %c0_i32_1 = arith.constant 0 : i32
    return %c0_i32, %c0_i32_0 : i32, i32
  }
  func.func @transform_4(%arg0: i32, %arg1: i32) -> (i32, i32) {
    %c0_i32 = arith.constant 0 : i32
    %c0_i32_0 = arith.constant 0 : i32
    %c0_i32_1 = arith.constant 0 : i32
    return %c0_i32, %c0_i32_0 : i32, i32
  }
  func.func @transform_5(%arg0: i32, %arg1: i32) -> (i32, i32) {
    %c0_i32 = arith.constant 0 : i32
    %c0_i32_0 = arith.constant 0 : i32
    return %arg0, %c0_i32 : i32, i32
  }
  func.func @transform_6(%arg0: i32, %arg1: i32) -> (i32, i32) {
    %c0_i32 = arith.constant 0 : i32
    %c0_i32_0 = arith.constant 0 : i32
    return %arg0, %c0_i32 : i32, i32
  }
}

</mosaic_0001>

<bundles_post_ra>
// kernel: tpu_custom_call.1
= control target key start
LH: loop header
LB: loop body
LE: loop exit
PB: predicated region body
PF: predicated region fallthrough
CT: control target
= control target key end

     0   :  { %v33_v0 = vlaneseq  ;;  %v286_v1 = vmov 0   ;;  %v287_v2 = vmov 1966171168   ;;  %vm26_vm2 = vcmask 254976   ;;  %s373_s1 = inlined_call_operand.vmem [shape: s32[2,1], index: 1, kind: input, shape index: {}]   ;;  %s374_s2 = inlined_call_operand.vmem [shape: s32[2,1], index: 2, kind: input, shape index: {}]   ;;  %s375_s3 = inlined_call_operand.vmem [shape: f32[32,4], index: 3, kind: input, shape index: {}]   ;;  %s376_s0 = inlined_call_operand.vmem [shape: f32[2,8,32], index: 0, kind: input, shape index: {}]   ;;  %s377_s4 = inlined_call_operand.vmem [shape: f32[1,4], index: 4, kind: input, shape index: {}]   ;;  %s378_s6 = inlined_call_operand.vmem [shape: f32[2,1], index: 6, kind: output, shape index: {1}]   ;;  %s379_s5 = inlined_call_operand.vmem [shape: s32[2,1], index: 5, kind: output, shape index: {0}]  }
   0x1   :  { %281 = vset.pattern.permute.xlu0 %v286_v1  ;;  %v47_v3 = vunpack.c.l.s4 %v287_v2  ;;  %v249_v4 = vld.sshfl [vmem:[%s373_s1] sm:$0x11 pattern:$0x75316420]  ;;  %v288_v17 = vmov -1e+30  }
   0x2   :  { %v34_v5 = vshrl.u32 %v33_v0, 7  ;;  %v45_v7 = vcombine.high %v249_v4, %v249_v4  ;;  %v228_v16 = vld [vmem:[%s374_s2] sm:$0x3]  ;;  %27 = vst.msk [vmem:[#allocation2] sm:$0x3] %vm26_vm2, %v288_v17  ;;  %v111_v19 = vld [vmem:[%s375_s3 + $0x8] sm:$0xff] }
   0x3   :  { %v48_v6 = vunpack.c.0.s8 %v47_v3  ;;  %v110_v18 = vld [vmem:[%s375_s3] sm:$0xff]  ;;  %vm28_vm3 = vcmask 1024   ;;  %v289_v21 = vmov 0.0|0.0   ;;  %v112_v22 = vld [vmem:[%s375_s3 + $0x10] sm:$0xff]  ;;  %v113_v23 = vld [vmem:[%s375_s3 + $0x18] sm:$0xff]  ;;  %vm290_vm4 = vmmov 0  }
   0x4   :  { %v62_v9 = vsub.s32 0, %v34_v5  ;;  %v270_v20 = vpack.c.bf16 %v111_v19, %v110_v18  ;;  %269 = vmatprep.subr.bf16.mxu0 %v289_v21  ;;  %v273_v24 = vpack.c.bf16 %v113_v23, %v112_v22  ;;  %v291_v25 = vmov 0.0   ;;  %v30_v26 = vld [vmem:[%s376_s0] sm:$0xff]  ;;  %v31_v30 = vld [vmem:[%s376_s0 + $0x8] sm:$0xff] }
   0x5   :  { %v51_v8 = vsub.s32 %v48_v6, %v34_v5  ;;  %266 = vmatprep.mubr.msk.f32.mxu0 %vm290_vm4, %v291_v25  ;;  %vm82_vm5 = vcmask 261120   ;;  %vm100_vm8 = vcmask 1041409   ;;  %v250_v50 = vld [vmem:[%s377_s4] ss:$0 sm:$0xff]  ;;  %vm194_vm9 = vcmask 25600  }
   0x6   :  { %271 = vmatpush3.bf16.msra.mxu0 %v270_v20  ;;  %v199_v55 = vand.u32 127, %v33_v0 }
   0x7   :  { %v52_v10 = vrot.slane %v249_v4, %v51_v8  ;;  %v59_v11 = vrot.slane %v45_v7, %v51_v8  ;;  %272 = vmatprep.subr.bf16.mxu0 %v289_v21 }
   0x9   :  { %v63_v12 = vrot.slane %v52_v10, %v62_v9  ;;  %v67_v13 = vrot.slane %v59_v11, %v62_v9  ;;  %v97_v45 = vld [vmem:[#allocation2] sm:$0x3] }
   0xa   :  { %274 = vmatpush3.bf16.msra.mxu0 %v273_v24 }
   0xb   :  { %vm68_vm0 = vcmp.lt.s32.totalorder %v34_v5, %v63_v12  ;;  %vm69_vm1 = vcmp.lt.s32.totalorder %v34_v5, %v67_v13 }
   0xc   :  { %v70_v14 = vsel %vm68_vm0, 1, %v286_v1  ;;  %v71_v15 = vsel %vm69_vm1, 1, %v286_v1 }
   0xd   :  { %73 = vperm.xlu0 %281, %v70_v14  }
  0x11   :  { %76 = vperm.xlu0 %281, %v71_v15  }
  0x15   :  { %230 = vperm.xlu0 %281, %v228_v16  }
  0x8c   :  { %v74_v27 = vpop.permute.xlu0 %73 }
  0x8d   :  { %vm78_vm6 = vcmp.eq.s32.totalorder %v74_v27, 1 }
  0x8e   :  { %v80_v28 = vsel %vm78_vm6, %v30_v26, -1e+30 }
  0x8f   :  { %v83_v29 = vsel %vm82_vm5, %v80_v28, -inf }
  0x90   :  { %v84_v31 = vrot.slane %v83_v29, 4  ;;  %v77_v32 = vpop.permute.xlu0 %76 }
  0x91   :  { %vm79_vm7 = vcmp.eq.s32.totalorder %v77_v32, 1 }
  0x92   :  { %v85_v33 = vmax.f32 %v83_v29, %v84_v31  ;;  %v81_v34 = vsel %vm79_vm7, %v31_v30, -1e+30 }
  0x93   :  { %v90_v35 = vsel %vm82_vm5, %v81_v34, -inf }
  0x94   :  { %v86_v36 = vrot.slane %v85_v33, 2  ;;  %v91_v37 = vrot.slane %v90_v35, 4  ;;  %v231_v63 = vpop.permute.xlu0 %230 }
  0x95   :  { %vm232_vm11 = vcmp.eq.s32.totalorder %v199_v55, %v231_v63 }
  0x96   :  { %v87_v38 = vmax.f32 %v85_v33, %v86_v36  ;;  %v92_v39 = vmax.f32 %v90_v35, %v91_v37  ;;  %v252_v2 = vsel %vm232_vm11, 1.0, %v291_v25 }
  0x98   :  { %v93_v40 = vrot.slane %v92_v39, 2  ;;  %v88_v41 = vrot.slane %v87_v38, 1 }
  0x9a   :  { %v94_v42 = vmax.f32 %v92_v39, %v93_v40  ;;  %v89_v44 = vmax.f32 %v87_v38, %v88_v41 }
  0x9c   :  { %v95_v43 = vrot.slane %v94_v42, 1 }
  0x9e   :  { %v96_v46 = vmax.f32 %v94_v42, %v95_v43 }
  0xa0   :  { %v101_v47 = vsel %vm100_vm8, %v96_v46, %v89_v44 }
  0xa1   :  { %v103_v48 = vmax.f32 %v97_v45, %v101_v47 }
  0xa3   :  { %105 = vst.msk [vmem:[#allocation2] sm:$0x3] %vm26_vm2, %v103_v48 }
  0xaa   :  { %v109_v49 = vld [vmem:[#allocation2] sm:$0x3] }
  0xab   :  { %267 = vmatmul.mubr.msk.f32.vlgmr.msra.gmra.mrb[0].mxu0 %vm82_vm5, %v109_v49 }
 0x17e   :  { %v190_v51 = vpop.f32.mrb[0].mxu0 }
 0x17f   :  { %v191_v52 = vadd.f32 %v250_v50, %v190_v51  ;;  %v268_v53 = vpop.f32.mrb[1].mxu0 }
 0x181   :  { %v195_v54 = vsel %vm194_vm9, %v191_v52, -inf  ;;  %v235_v4 = vmul.f32 %v252_v2, %v191_v52 }
 0x182   :  { %196 = vmax.xlane.f32.xlu1 %v195_v54 }
 0x183   :  { %v236_v0 = vsel %vm194_vm9, %v235_v4, 0.0 }
 0x20f   :  { %v197_v56 = vpop.xlane.xlu1 %196 }
 0x210   :  { %vm200_vm10 = vcmp.eq.f32.partialorder %v191_v52, %v197_v56  ;;  %v219_v57 = vsub.f32 %v191_v52, %v197_v56 }
 0x211   :  { %v201_v58 = vsel %vm200_vm10, %v199_v55, 4 }
 0x212   :  { %v220_v59 = vmul.f32 1.442695, %v219_v57  ;;  %v202_v60 = vsel %vm194_vm9, %v201_v58, 2147483647 }
 0x213   :  { %v204_v61 = vshra.s32 %v202_v60, 16  ;;  %v203_v5 = vand.u32 65535, %v202_v60 }
 0x214   :  { %282 = vpow2.f32 %v220_v59 }
 0x215   :  { %v206_v62 = vcvt.s32.f32 %v204_v61  ;;  %v205_v7 = vcvt.s32.f32 %v203_v5 }
 0x217   :  { %207 = vmin.xlane.f32.xlu1 %v206_v62 }
 0x21e   :  { %v283_v1 = vpop.eup %282 }
 0x21f   :  { %v222_v3 = vsel %vm194_vm9, %v283_v1, 0.0 }
 0x220   :  { %223 = vadd.xlane.f32.xlu1 %v222_v3 }
 0x224   :  { %237 = vadd.xlane.f32.xlu1 %v236_v0 }
 0x2a4   :  { %v208_v6 = vpop.xlane.xlu1 %207 }
 0x2a5   :  { %vm209_vm12 = vcmp.eq.f32.partialorder %v206_v62, %v208_v6  ;;  %v214_v15 = vcvt.f32.s32 %v208_v6 }
 0x2a6   :  { %v210_v8 = vsel %vm209_vm12, %v205_v7, inf }
 0x2a7   :  { %211 = vmin.xlane.f32.xlu0 %v210_v8  ;;  %v215_v17 = vshll.u32 %v214_v15, 16 }
 0x2ad   :  { %v224_v9 = vpop.xlane.xlu1 %223 }
 0x2ae   :  { %284 = vlog2.f32 %v224_v9 }
 0x2b1   :  { %v238_v13 = vpop.xlane.xlu1 %237 }
 0x2b8   :  { %v285_v10 = vpop.eup %284 }
 0x2b9   :  { %v226_v11 = vmul.f32 0.6931472, %v285_v10 }
 0x2bb   :  { %v227_v12 = vadd.f32 %v226_v11, %v197_v56 }
 0x2bd   :  { %v239_v14 = vsub.f32 %v227_v12, %v238_v13 }
 0x2bf   :  { %240 = vst.msk [vmem:[%s378_s6] sm:$0x3] %vm28_vm3, %v239_v14 }
 0x334   :  { %v212_v16 = vpop.xlane.xlu0 %211 }
 0x335   :  { %v213_v18 = vcvt.f32.s32 %v212_v16 }
 0x337   :  { %v216_v19 = vadd.s32 %v215_v17, %v213_v18 }
 0x339   :  { %218 = vst.msk [vmem:[%s379_s5] sm:$0x3] %vm28_vm3, %v216_v19 }

</bundles_post_ra>
